<compile_context>
chip_gen: v7x
topology: tpu7x:2x2x1
jax: 0.10.0
libtpu: 0.0.40
codegen_flags: <defaults>
</compile_context>

<pallas_src>
import functools

import jax
import jax.numpy as jnp
from jax.experimental import pallas as pl
from jax.experimental.pallas import tpu as pltpu


# ---------------------------------------------------------------------------
# Fused kernel: AE (2 matmuls + bias) + EuclideanDistance + row-normalize.
# All operands arrive pre-transposed; no padded feature columns.
# ---------------------------------------------------------------------------
def _fused_kernel(x_ref, we_t_ref, be_ref, wd_t_ref, bd_ref,
                  c_neg2t_ref, c_sq_ref, recon_ref, q_ref):
    x = x_ref[...]                                                    # [TB, IN]

    # encoder: z = x @ We^T + be
    z = jnp.dot(x, we_t_ref[...], preferred_element_type=jnp.float32) + be_ref[...]

    # decoder: recon = z @ Wd^T + bd
    recon_ref[...] = (jnp.dot(z, wd_t_ref[...], preferred_element_type=jnp.float32)
                      + bd_ref[...])

    # EuclideanDistance(z, C): z @ (-2 C^T) + ||z||^2 + ||C||^2
    d = jnp.dot(z, c_neg2t_ref[...], preferred_element_type=jnp.float32)  # [TB, NC]
    d = d + jnp.sum(z * z, axis=-1, keepdims=True)                        # [TB, 1]
    d = d + c_sq_ref[...]                                                 # [1, NC]
    d = jnp.sqrt(jnp.maximum(d, 0.0))   # clamp guards f32-rounding negatives

    s = jnp.sum(d, axis=-1, keepdims=True)                                # [TB, 1]
    q_ref[...] = d / s


def _round_up(n, m):
    return ((n + m - 1) // m) * m


def _cdiv(a, b):
    return (a + b - 1) // b


# ---------------------------------------------------------------------------
# Wrapper: layout plumbing (pre-transpose, batch pad), grid/BlockSpec setup.
# ---------------------------------------------------------------------------
@functools.partial(jax.jit, static_argnames=("block_b",))
def multilabel_net_forward(x, we, be, wd, bd, cluster_layer, *, block_b=1024):
    """Equivalent of MultilabelNet.forward: returns (x_reconstruct1, q)."""
    f32 = jnp.float32
    B, in_dim = x.shape
    latent = we.shape[0]
    n_clusters = cluster_layer.shape[0]

    # Batch tiling: n_tiles tiles of equal size (multiple of 8); when
    # B > block_b this is automatically >= 2 tiles (v7x megacore sharding).
    n_tiles = max(1, _cdiv(B, block_b))
    tb = _round_up(_cdiv(B, n_tiles), 8)
    b_pad = tb * n_tiles

    # One-time layout plumbing (no feature-dim padding).
    x_p = x.astype(f32)
    if b_pad != B:
        x_p = jnp.zeros((b_pad, in_dim), f32).at[:B, :].set(x_p)
    we_t = we.T.astype(f32)                                   # [IN, LAT]
    be_p = be.reshape(1, latent).astype(f32)                  # [1, LAT]
    wd_t = wd.T.astype(f32)                                   # [LAT, IN]
    bd_p = bd.reshape(1, in_dim).astype(f32)                  # [1, IN]
    c_neg2t = (-2.0 * cluster_layer.T).astype(f32)            # [LAT, NC]
    c_sq = jnp.sum(cluster_layer.astype(f32) ** 2, axis=-1)[None, :]  # [1, NC]

    cost = pl.CostEstimate(
        flops=2 * b_pad * (in_dim * latent + latent * in_dim + latent * n_clusters),
        transcendentals=b_pad * n_clusters,
        bytes_accessed=4 * (b_pad * (2 * in_dim + n_clusters)
                            + 2 * in_dim * latent + latent * n_clusters),
    )

    recon_p, q_p = pl.pallas_call(
        _fused_kernel,
        out_shape=(
            jax.ShapeDtypeStruct((b_pad, in_dim), f32),
            jax.ShapeDtypeStruct((b_pad, n_clusters), f32),
        ),
        grid_spec=pltpu.PrefetchScalarGridSpec(
            num_scalar_prefetch=0,
            grid=(n_tiles,),
            in_specs=[
                pl.BlockSpec((tb, in_dim), lambda i: (i, 0)),        # x tile
                pl.BlockSpec((in_dim, latent), lambda i: (0, 0)),    # We^T (resident)
                pl.BlockSpec((1, latent), lambda i: (0, 0)),         # be
                pl.BlockSpec((latent, in_dim), lambda i: (0, 0)),    # Wd^T (resident)
                pl.BlockSpec((1, in_dim), lambda i: (0, 0)),         # bd
                pl.BlockSpec((latent, n_clusters), lambda i: (0, 0)),  # -2 C^T (resident)
                pl.BlockSpec((1, n_clusters), lambda i: (0, 0)),     # ||C||^2
            ],
            out_specs=[
                pl.BlockSpec((tb, in_dim), lambda i: (i, 0)),        # recon tile
                pl.BlockSpec((tb, n_clusters), lambda i: (i, 0)),    # q tile
            ],
        ),
        compiler_params=pltpu.CompilerParams(
            dimension_semantics=("parallel",),
            vmem_limit_bytes=32 * 1024 * 1024,   # safe on v7x (64 MiB) and v5e/v6e
        ),
        cost_estimate=cost,
    )(x_p, we_t, be_p, wd_t, bd_p, c_neg2t, c_sq)

    return recon_p[:B, :], q_p[:B, :]


# ---------------------------------------------------------------------------
# Pure-JAX reference (mirrors the PyTorch code) for a correctness check.
# ---------------------------------------------------------------------------
def reference_forward(x, we, be, wd, bd, cluster_layer):
    z = x @ we.T + be
    recon = z @ wd.T + bd
    dist = -2.0 * (z @ cluster_layer.T)
    dist = dist + jnp.sum(z ** 2, -1)[:, None]
    dist = dist + jnp.sum(cluster_layer ** 2, -1)[None, :]
    dist = jnp.sqrt(dist)
    q = dist / jnp.sum(dist, axis=1, keepdims=True)
    return recon, q


if __name__ == "__main__":
    IN_DIM, LATENT, N_CLUSTERS = 32, 16, 10

    key = jax.random.PRNGKey(0)
    k_x, k_we, k_wd, k_cl, k_x2 = jax.random.split(key, 5)

    # Deterministic parameter init (xavier-normal-like scales).
    we = jax.random.normal(k_we, (LATENT, IN_DIM), jnp.float32) * jnp.sqrt(
        2.0 / (LATENT + IN_DIM))
    be = jnp.zeros((1, LATENT), jnp.float32)
    wd = jax.random.normal(k_wd, (IN_DIM, LATENT), jnp.float32) * jnp.sqrt(
        2.0 / (IN_DIM + LATENT))
    bd = jnp.zeros((1, IN_DIM), jnp.float32)
    cluster_layer = jax.random.normal(
        k_cl, (N_CLUSTERS, LATENT), jnp.float32) * jnp.sqrt(
        2.0 / (N_CLUSTERS + LATENT))

    # --- small batch (single grid step) ---
    B = 8
    x = jax.random.normal(k_x, (B, IN_DIM), dtype=jnp.float32)
    recon, q = multilabel_net_forward(x, we, be, wd, bd, cluster_layer)
    jax.block_until_ready((recon, q))
    recon_ref, q_ref = reference_forward(x, we, be, wd, bd, cluster_layer)
    assert recon.shape == (B, IN_DIM) and q.shape == (B, N_CLUSTERS)
    assert jnp.allclose(recon, recon_ref, atol=1e-4, rtol=1e-4)
    assert jnp.allclose(q, q_ref, atol=1e-4, rtol=1e-4)

    # --- ragged batch (multi-tile grid + padded batch rows exercised) ---
    B2 = 300
    x2 = jax.random.normal(k_x2, (B2, IN_DIM), dtype=jnp.float32)
    recon2, q2 = multilabel_net_forward(x2, we, be, wd, bd, cluster_layer,
                                        block_b=128)
    jax.block_until_ready((recon2, q2))
    recon2_ref, q2_ref = reference_forward(x2, we, be, wd, bd, cluster_layer)
    assert recon2.shape == (B2, IN_DIM) and q2.shape == (B2, N_CLUSTERS)
    assert jnp.allclose(recon2, recon2_ref, atol=1e-4, rtol=1e-4)
    assert jnp.allclose(q2, q2_ref, atol=1e-4, rtol=1e-4)

    print("KERNEL_OK")
</pallas_src>

<mosaic_0001>
module attributes {stable_mosaic.version = 11 : i64} {
  func.func @_fused_kernel(%arg0: i32, %arg1: memref<8x32xf32, #tpu.memory_space<vmem>>, %arg2: memref<32x16xf32, #tpu.memory_space<vmem>>, %arg3: memref<1x16xf32, #tpu.memory_space<vmem>>, %arg4: memref<16x32xf32, #tpu.memory_space<vmem>>, %arg5: memref<1x32xf32, #tpu.memory_space<vmem>>, %arg6: memref<16x10xf32, #tpu.memory_space<vmem>>, %arg7: memref<1x10xf32, #tpu.memory_space<vmem>>, %arg8: memref<8x32xf32, #tpu.memory_space<vmem>>, %arg9: memref<8x10xf32, #tpu.memory_space<vmem>>) attributes {dimension_semantics = [#tpu.dimension_semantics<parallel>], iteration_bounds = array<i64: 1>, scalar_prefetch = 0 : i64, scratch_operands = 0 : i64, tpu.core_type = #tpu.core_type<tc>, window_params = [{transform_indices = @transform_0, window_bounds = array<i64: 8, 32>}, {pipeline_mode = #tpu.pipeline_mode<synchronous>, transform_indices = @transform_1, window_bounds = array<i64: 32, 16>}, {pipeline_mode = #tpu.pipeline_mode<synchronous>, transform_indices = @transform_2, window_bounds = array<i64: 1, 16>}, {pipeline_mode = #tpu.pipeline_mode<synchronous>, transform_indices = @transform_3, window_bounds = array<i64: 16, 32>}, {pipeline_mode = #tpu.pipeline_mode<synchronous>, transform_indices = @transform_4, window_bounds = array<i64: 1, 32>}, {pipeline_mode = #tpu.pipeline_mode<synchronous>, transform_indices = @transform_5, window_bounds = array<i64: 16, 10>}, {pipeline_mode = #tpu.pipeline_mode<synchronous>, transform_indices = @transform_6, window_bounds = array<i64: 1, 10>}, {transform_indices = @transform_7, window_bounds = array<i64: 8, 32>}, {transform_indices = @transform_8, window_bounds = array<i64: 8, 10>}]} {
    %c0 = arith.constant 0 : index
    %c0_0 = arith.constant 0 : index
    %0 = vector.load %arg1[%c0, %c0_0] : memref<8x32xf32, #tpu.memory_space<vmem>>, vector<8x32xf32>
    %c0_1 = arith.constant 0 : index
    %c0_2 = arith.constant 0 : index
    %1 = vector.load %arg2[%c0_1, %c0_2] : memref<32x16xf32, #tpu.memory_space<vmem>>, vector<32x16xf32>
    %cst = arith.constant dense<0.000000e+00> : vector<8x16xf32>
    %2 = tpu.matmul %0, %1, %cst {dimension_numbers = #tpu.dot_dimension_numbers<[1], [0], [0], [1], [0, 0, 1, 1], [], []>} : vector<8x32xf32>, vector<32x16xf32>, vector<8x16xf32> -> vector<8x16xf32>
    %c0_3 = arith.constant 0 : index
    %c0_4 = arith.constant 0 : index
    %3 = vector.load %arg3[%c0_3, %c0_4] : memref<1x16xf32, #tpu.memory_space<vmem>>, vector<1x16xf32>
    %4 = vector.broadcast %3 : vector<1x16xf32> to vector<8x16xf32>
    %5 = arith.addf %2, %4 : vector<8x16xf32>
    %c0_5 = arith.constant 0 : index
    %c0_6 = arith.constant 0 : index
    %6 = vector.load %arg4[%c0_5, %c0_6] : memref<16x32xf32, #tpu.memory_space<vmem>>, vector<16x32xf32>
    %cst_7 = arith.constant dense<0.000000e+00> : vector<8x32xf32>
    %7 = tpu.matmul %5, %6, %cst_7 {dimension_numbers = #tpu.dot_dimension_numbers<[1], [0], [0], [1], [0, 0, 1, 1], [], []>} : vector<8x16xf32>, vector<16x32xf32>, vector<8x32xf32> -> vector<8x32xf32>
    %c0_8 = arith.constant 0 : index
    %c0_9 = arith.constant 0 : index
    %8 = vector.load %arg5[%c0_8, %c0_9] : memref<1x32xf32, #tpu.memory_space<vmem>>, vector<1x32xf32>
    %9 = vector.broadcast %8 : vector<1x32xf32> to vector<8x32xf32>
    %10 = arith.addf %7, %9 : vector<8x32xf32>
    %c0_10 = arith.constant 0 : index
    %c0_11 = arith.constant 0 : index
    %11 = vector.load %arg8[%c0_10, %c0_11] : memref<8x32xf32, #tpu.memory_space<vmem>>, vector<8x32xf32>
    tpu.vector_store %arg8[%c0_10, %c0_11], %10 {strides = array<i32>} : memref<8x32xf32, #tpu.memory_space<vmem>>, vector<8x32xf32>,
    %c0_12 = arith.constant 0 : index
    %c0_13 = arith.constant 0 : index
    %12 = vector.load %arg6[%c0_12, %c0_13] : memref<16x10xf32, #tpu.memory_space<vmem>>, vector<16x10xf32>
    %cst_14 = arith.constant dense<0.000000e+00> : vector<8x10xf32>
    %13 = tpu.matmul %5, %12, %cst_14 {dimension_numbers = #tpu.dot_dimension_numbers<[1], [0], [0], [1], [0, 0, 1, 1], [], []>} : vector<8x16xf32>, vector<16x10xf32>, vector<8x10xf32> -> vector<8x10xf32>
    %14 = arith.mulf %5, %5 : vector<8x16xf32>
    %cst_15 = arith.constant dense<0.000000e+00> : vector<8xf32>
    %15 = vector.multi_reduction <add>, %14, %cst_15 [1] : vector<8x16xf32> to vector<8xf32>
    %16 = vector.shape_cast %15 : vector<8xf32> to vector<8x1xf32>
    %17 = vector.broadcast %16 : vector<8x1xf32> to vector<8x10xf32>
    %18 = arith.addf %13, %17 : vector<8x10xf32>
    %c0_16 = arith.constant 0 : index
    %c0_17 = arith.constant 0 : index
    %19 = vector.load %arg7[%c0_16, %c0_17] : memref<1x10xf32, #tpu.memory_space<vmem>>, vector<1x10xf32>
    %20 = vector.broadcast %19 : vector<1x10xf32> to vector<8x10xf32>
    %21 = arith.addf %18, %20 : vector<8x10xf32>
    %cst_18 = arith.constant 0.000000e+00 : f32
    %22 = vector.broadcast %cst_18 : f32 to vector<8x10xf32>
    %23 = arith.maximumf %21, %22 : vector<8x10xf32>
    %24 = math.sqrt %23 : vector<8x10xf32>
    %cst_19 = arith.constant dense<0.000000e+00> : vector<8xf32>
    %25 = vector.multi_reduction <add>, %24, %cst_19 [1] : vector<8x10xf32> to vector<8xf32>
    %26 = vector.shape_cast %25 : vector<8xf32> to vector<8x1xf32>
    %27 = vector.broadcast %26 : vector<8x1xf32> to vector<8x10xf32>
    %28 = arith.divf %24, %27 : vector<8x10xf32>
    %c0_20 = arith.constant 0 : index
    %c0_21 = arith.constant 0 : index
    %29 = vector.load %arg9[%c0_20, %c0_21] : memref<8x10xf32, #tpu.memory_space<vmem>>, vector<8x10xf32>
    tpu.vector_store %arg9[%c0_20, %c0_21], %28 {strides = array<i32>} : memref<8x10xf32, #tpu.memory_space<vmem>>, vector<8x10xf32>,
    return
  }
  func.func @transform_0(%arg0: i32) -> (i32, i32) {
    %c0_i32 = arith.constant 0 : i32
    %c0_i32_0 = arith.constant 0 : i32
    return %arg0, %c0_i32 : i32, i32
  }
  func.func @transform_1(%arg0: i32) -> (i32, i32) {
    %c0_i32 = arith.constant 0 : i32
    %c0_i32_0 = arith.constant 0 : i32
    %c0_i32_1 = arith.constant 0 : i32
    return %c0_i32, %c0_i32_0 : i32, i32
  }
  func.func @transform_2(%arg0: i32) -> (i32, i32) {
    %c0_i32 = arith.constant 0 : i32
    %c0_i32_0 = arith.constant 0 : i32
    %c0_i32_1 = arith.constant 0 : i32
    return %c0_i32, %c0_i32_0 : i32, i32
  }
  func.func @transform_3(%arg0: i32) -> (i32, i32) {
    %c0_i32 = arith.constant 0 : i32
    %c0_i32_0 = arith.constant 0 : i32
    %c0_i32_1 = arith.constant 0 : i32
    return %c0_i32, %c0_i32_0 : i32, i32
  }
  func.func @transform_4(%arg0: i32) -> (i32, i32) {
    %c0_i32 = arith.constant 0 : i32
    %c0_i32_0 = arith.constant 0 : i32
    %c0_i32_1 = arith.constant 0 : i32
    return %c0_i32, %c0_i32_0 : i32, i32
  }
  func.func @transform_5(%arg0: i32) -> (i32, i32) {
    %c0_i32 = arith.constant 0 : i32
    %c0_i32_0 = arith.constant 0 : i32
    %c0_i32_1 = arith.constant 0 : i32
    return %c0_i32, %c0_i32_0 : i32, i32
  }
  func.func @transform_6(%arg0: i32) -> (i32, i32) {
    %c0_i32 = arith.constant 0 : i32
    %c0_i32_0 = arith.constant 0 : i32
    %c0_i32_1 = arith.constant 0 : i32
    return %c0_i32, %c0_i32_0 : i32, i32
  }
  func.func @transform_7(%arg0: i32) -> (i32, i32) {
    %c0_i32 = arith.constant 0 : i32
    %c0_i32_0 = arith.constant 0 : i32
    return %arg0, %c0_i32 : i32, i32
  }
  func.func @transform_8(%arg0: i32) -> (i32, i32) {
    %c0_i32 = arith.constant 0 : i32
    %c0_i32_0 = arith.constant 0 : i32
    return %arg0, %c0_i32 : i32, i32
  }
}

</mosaic_0001>

<bundles_post_ra>
// kernel: multilabel_net_forward.1
= control target key start
LH: loop header
LB: loop body
LE: loop exit
PB: predicated region body
PF: predicated region fallthrough
CT: control target
= control target key end

     0   :  { %14 = vsyncpa [#allocation3], 0  ;;  %v438_v3 = vmov 0.0|0.0   ;;  %vm439_vm0 = vmmov 0   ;;  %v440_v6 = vmov 0.0   ;;  %s555_s0 = inlined_call_operand.vmem [shape: f32[8,32], index: 0, kind: input, shape index: {}]   ;;  %s556_s1 = inlined_call_operand.vmem [shape: f32[32,16], index: 1, kind: input, shape index: {}]   ;;  %s557_s2 = inlined_call_operand.vmem [shape: f32[1,16], index: 2, kind: input, shape index: {}]   ;;  %s558_s3 = inlined_call_operand.vmem [shape: f32[16,32], index: 3, kind: input, shape index: {}]   ;;  %s559_s4 = inlined_call_operand.vmem [shape: f32[1,32], index: 4, kind: input, shape index: {}]   ;;  %s560_s5 = inlined_call_operand.vmem [shape: f32[16,10], index: 5, kind: input, shape index: {}]   ;;  %s561_s6 = inlined_call_operand.vmem [shape: f32[1,10], index: 6, kind: input, shape index: {}]   ;;  %s562_s7 = inlined_call_operand.hbm [shape: f32[8,32], index: 7, kind: output, shape index: {0}]   ;;  %s563_s8 = inlined_call_operand.hbm [shape: f32[8,10], index: 8, kind: output, shape index: {1}]  }
   0x1   :  { %v31_v0 = vld [vmem:[%s556_s1] sm:$0xff]  ;;  %v32_v1 = vld [vmem:[%s556_s1 + $0x8] sm:$0xff]  ;;  %v33_v2 = vld [vmem:[%s556_s1 + $0x10] sm:$0xff]  ;;  %369 = vmatprep.subr.bf16.mxu0 %v438_v3  ;;  %352 = vmatprep.mubr.msk.f32.mxu0 %vm439_vm0, %v440_v6 }
   0x2   :  { %v370_v4 = vpack.c.bf16 %v32_v1, %v31_v0  ;;  %v34_v5 = vld [vmem:[%s556_s1 + $0x18] sm:$0xff]  ;;  %v116_v7 = vld [vmem:[%s558_s3] sm:$0xff]  ;;  %375 = vmatprep.subr.bf16.mxu1 %v438_v3  ;;  %v117_v8 = vld [vmem:[%s558_s3 + $0x8] sm:$0xff]  ;;  %359 = vmatprep.mubr.msk.f32.mxu1 %vm439_vm0, %v440_v6 }
   0x3   :  { %15 = vsyncpa [#allocation5], 0  ;;  %v373_v9 = vpack.c.bf16 %v34_v5, %v33_v2  ;;  %v376_v10 = vpack.c.bf16 %v117_v8, %v116_v7  ;;  %v30_v11 = vld [vmem:[%s555_s0] sm:$0xff]  ;;  %vm42_vm1 = vcmask 261120   ;;  %v201_v13 = vld [vmem:[%s560_s5 + $0x8] sm:$0xff]  ;;  %vm125_vm2 = vcmask 130048  }
   0x4   :  { %371 = vmatpush3.bf16.msra.mxu0 %v370_v4  ;;  %v200_v12 = vld [vmem:[%s560_s5] sm:$0xff]  ;;  %vm292_vm4 = vcmask 80896  }
   0x5   :  { %372 = vmatprep.subr.bf16.mxu0 %v438_v3  ;;  %377 = vmatpush3.bf16.msra.mxu1 %v376_v10  ;;  %v327_v14 = vld [vmem:[%s557_s2] ss:$0 sm:$0xff]  ;;  %v379_v16 = vpack.c.bf16 %v201_v13, %v200_v12 }
   0x6   :  { %378 = vmatprep.subr.bf16.mxu1 %v438_v3  ;;  %v329_v21 = vld [vmem:[%s559_s4] ss:$0 sm:$0xff]  ;;  %s441_s4 = smov [#allocation2]  }
   0x7   :  { %v332_v27 = vld [vmem:[%s561_s6] ss:$0 sm:$0xff]  ;;  %s305_s24 = sshll.u32 %s441_s4, 4  ;;  %s306_s24 = int_to_ptr.vmem [resolvable:$true] %s305_s24 }
   0x8   :  { %374 = vmatpush3.bf16.msra.mxu0 %v373_v9  ;;  %s390_s6 = scalar_lea.vmem %s306_s24, 128  ;;  %p395_p1 = scmp.lt.s32.totalorder %s306_s24, %s306_s24 }
   0x9   :  { %p391_p0 = scmp.ne.s32.totalorder %s306_s24, %s390_s6  ;;  %p396_p2 = scmp.lt.s32.totalorder %s390_s6, %s390_s6 }
   0xb   :  { %353 = vmatmul.mubr.msk.f32.vlgmr.msra.gmra.mrb[0].mxu0 %vm42_vm1, %v30_v11  ;;  %p397_p3 = por %p396_p2, %p395_p1 }
   0xd   :  { %p398_p4 = pnand %p397_p3, %p391_p0 }
  0xde   :  { %v112_v15 = vpop.f32.mrb[0].mxu0 }
  0xdf   :  { %v113_v17 = vadd.f32 %v327_v14, %v112_v15  ;;  %v354_v18 = vpop.f32.mrb[1].mxu0 }
  0xe1   :  { %360 = vmatmul.mubr.msk.f32.vlgmr.msra.gmra.mrb[0].mxu1 %vm125_vm2, %v113_v17  ;;  %v202_v19 = vmul.f32 %v113_v17, %v113_v17 }
  0xe2   :  { %380 = vmatpush3.bf16.msra.mxu1 %v379_v16  ;;  %366 = vmatprep.mubr.msk.f32.mxu1 %vm439_vm0, %v440_v6 }
  0xe3   :  { %v203_v20 = vsel %vm125_vm2, %v202_v19, 0.0 }
  0xe4   :  { %204 = vadd.xlane.f32.xlu0 %v203_v20 }
  0xe5   :  { %367 = vmatmul.mubr.msk.f32.vlgmr.msra.gmra.mrb[2].mxu1 %vm125_vm2, %v113_v17 }
 0x171   :  { %v205_v25 = vpop.xlane.xlu0 %204 }
 0x1b4   :  { %v195_v22 = vpop.f32.mrb[0].mxu1 }
 0x1b5   :  { %v196_v23 = vadd.f32 %v329_v21, %v195_v22  ;;  %v361_v24 = vpop.f32.mrb[1].mxu1 }
 0x1b7   :  { %199 = vst.msk [vmem:[#allocation2] sm:$0xff] %vm42_vm1, %v196_v23 }
 0x1b8   :  { %v272_v26 = vpop.f32.mrb[2].mxu1 }
 0x1b9   :  { %v273_v28 = vadd.f32 %v272_v26, %v205_v25  ;;  %v368_v29 = vpop.f32.mrb[3].mxu1 }
 0x1bb   :  { %v283_v30 = vadd.f32 %v332_v27, %v273_v28 }
 0x1bd   :  { %v284_v31 = vmax.f32 %v283_v30, 0.0 }
 0x1bf   :  { %386 = vrsqrt.f32 %v284_v31  ;;  %vm287_vm3 = vcmp.eq.f32.partialorder %v284_v31, inf  ;;  %v290_v34 = vand.u32 2147483648, %v284_v31  ;;  %vm289_vm5 = vcmp.eq.f32.partialorder %v284_v31, 0.0 }
 0x1c9   :  { %v387_v32 = vpop.eup %386 }
 0x1ca   :  { %v286_v33 = vmul.f32 %v387_v32, %v284_v31 }
 0x1cc   :  { %v288_v35 = vsel %vm287_vm3, %v284_v31, %v286_v33 }
 0x1cd   :  { %v291_v36 = vsel %vm289_vm5, %v290_v34, %v288_v35 }
 0x1ce   :  { %v293_v37 = vsel %vm292_vm4, %v291_v36, 0.0 }
 0x1cf   :  { %294 = vadd.xlane.f32.xlu0 %v293_v37 }
 0x1d0   :  { %401 = shalt.err (!%p398_p4)
}
 0x1d1   :  { %s402_s27 = scalar_lea.hbm %s562_s7, 128 }
 0x1d2   :  { %p403_p5 = scmp.ne.s32.totalorder %s562_s7, %s402_s27  ;;  %p406_p6 = scmp.lt.u32.totalorder %s402_s27, %s562_s7 }
 0x1d4   :  { %p408_p7 = pnand %p406_p6, %p403_p5 }
 0x1d6   :  { %411 = shalt.err (!%p408_p7)
}
 0x1d7   :  { %308 = dma.vmem_to_hbm [thread:$0]  %s306_s24, 128, %s562_s7, [#allocation3]  }
 0x1d8   :  { %s442_s12 = smov [#allocation4]  }
 0x1d9   :  { %s315_s13 = sshll.u32 %s442_s12, 4  ;;  %s316_s13 = int_to_ptr.vmem [resolvable:$true] %s315_s13 }
 0x1da   :  { %s412_s14 = scalar_lea.vmem %s316_s13, 128  ;;  %p417_p9 = scmp.lt.s32.totalorder %s316_s13, %s316_s13 }
 0x1db   :  { %p413_p8 = scmp.ne.s32.totalorder %s316_s13, %s412_s14  ;;  %p418_p10 = scmp.lt.s32.totalorder %s412_s14, %s412_s14 }
 0x1dd   :  { %p419_p11 = por %p418_p10, %p417_p9 }
 0x1df   :  { %p420_p12 = pnand %p419_p11, %p413_p8 }
 0x25c   :  { %v295_v38 = vpop.xlane.xlu0 %294 }
 0x25d   :  { %388 = vrcp.f32 %v295_v38 }
 0x267   :  { %v389_v39 = vpop.eup %388 }
 0x268   :  { %v297_v40 = vmul.f32 %v389_v39, %v291_v36 }
 0x26a   :  { %298 = vst.msk [vmem:[#allocation4] sm:$0xff] %vm292_vm4, %v297_v40 }
 0x26b   :  { %423 = shalt.err (!%p420_p12)
}
 0x26c   :  { %s424_s7 = scalar_lea.hbm %s563_s8, 128 }
 0x26d   :  { %p425_p13 = scmp.ne.s32.totalorder %s563_s8, %s424_s7  ;;  %p428_p0 = scmp.lt.u32.totalorder %s424_s7, %s563_s8 }
 0x26f   :  { %p430_p1 = pnand %p428_p0, %p425_p13 }
 0x271   :  { %433 = shalt.err (!%p430_p1)
}
 0x272   :  { %318 = dma.vmem_to_hbm [thread:$0]  %s316_s13, 128, %s563_s8, [#allocation5]  }
 0x273   :  { %434 = dma.done.wait [#allocation3], 128  }
 0x274   :  { %435 = vsyncadd [#allocation3], 4294967168 }
 0x275   :  { %436 = dma.done.wait [#allocation5], 128  }
 0x276   :  { %437 = vsyncadd [#allocation5], 4294967168 }
 0x277   :  { %325 = vsyncpa [#allocation3], 1 }
 0x278   :  { %326 = vsyncpa [#allocation5], 1 }

</bundles_post_ra>
